<compile_context>
chip_gen: v7x
topology: tpu7x:2x2x1
jax: 0.10.0
libtpu: 0.0.40
codegen_flags: <defaults>
</compile_context>

<pallas_src>
import functools

import jax
import jax.numpy as jnp
from jax import lax
from jax.experimental import pallas as pl
from jax.experimental.pallas import tpu as pltpu


_SUBLANE_PACK = {4: 8, 2: 16, 1: 32}   # itemsize -> sublane packing
_UNROLL_K = 8                          # fully unroll the extraction up to this k


def _get_positive_k(k, n):
    """Replicates get_positive_k from the PyTorch module (static, Python)."""
    if k is None:
        return 0
    if k <= 0:
        return 0
    elif k < 1:
        return int(round(k * n))
    elif k > n:
        return int(n)
    else:
        return int(k)


@functools.lru_cache(maxsize=None)
def _device_profile():
    """Returns (target_block_bytes, vmem_limit_bytes, min_grid_steps, bf16_select_ok)."""
    gen = None
    try:
        kind = jax.devices()[0].device_kind.lower()
    except Exception:
        kind = ""
    for g in (7, 6, 5, 4, 3, 2):
        if ("v%d" % g) in kind or ("tpu%d" % g) in kind:
            gen = g
            break

    vmem_bytes = None
    try:
        vmem_bytes = int(pltpu.get_tpu_info().vmem_capacity_bytes)
    except Exception:
        vmem_bytes = None
    if vmem_bytes is None:
        vmem_bytes = {7: 64 << 20, 6: 128 << 20, 5: 128 << 20, 4: 128 << 20,
                      3: 16 << 20, 2: 16 << 20}.get(gen, 64 << 20)

    if gen == 7 or vmem_bytes < (100 << 20):
        if vmem_bytes >= (48 << 20):
            # v7x class: 64 MiB VMEM per TensorCore -> smaller blocks, tight limit.
            target, limit = 2 << 20, 40 << 20
        else:
            # Old / small-VMEM parts: stay well inside the budget.
            target, limit = 512 << 10, max(8 << 20, (vmem_bytes * 3) // 4)
    else:
        # v5e / v6e class: 128 MiB VMEM -> bigger blocks, fewer grid steps.
        target, limit = 8 << 20, 96 << 20

    # v4/v5 VPUs have no native bf16: promote the selection working copy to f32.
    bf16_select_ok = (gen is None) or (gen >= 6)
    return target, limit, 8, bf16_select_ok


def _choose_row_tile(rows, n, itemsize, target_block_bytes, min_grid_steps):
    """Row-block size: ~target bytes of input, >= min_grid_steps grid steps,
    multiple of the sublane packing for this dtype."""
    sub = _SUBLANE_PACK.get(itemsize, 8)
    if rows <= sub:
        # Single block equal to the full row extent (allowed: full-dim block).
        return rows
    tile = max(1, target_block_bytes // max(n * itemsize, 1))
    # Keep >= min_grid_steps steps so both v7x TensorCores stay busy/balanced.
    tile = min(tile, pl.cdiv(rows, min_grid_steps))
    tile = max(sub, (tile // sub) * sub)
    return min(tile, ((rows + sub - 1) // sub) * sub)


def _wildcat_kernel(x_ref, o_ref, *, kmax, kmin, alpha, select_f32):
    """One (row_tile, N) block: per row, mean(top-kmax) + (alpha/kmin)*sum(bottom-kmin)."""
    x_in = x_ref[...]

    # Selection working dtype: bf16 stays bf16 on v6e/v7x (native bf16 VPU);
    # promoted to f32 on v4/v5 or for any other dtype.
    if x_in.dtype == jnp.float32:
        xsel = x_in
    elif x_in.dtype == jnp.bfloat16 and not select_f32:
        xsel = x_in
    else:
        xsel = x_in.astype(jnp.float32)
    # f32 view used only for the final masked row-sums (accumulate in f32).
    xf32 = x_in.astype(jnp.float32)

    # Built once, shared by both loops, read exactly once per extraction step.
    col = lax.broadcasted_iota(jnp.int32, xsel.shape, 1)

    def extreme_sum(k, largest):
        """f32 (row_tile, 1) sum of each row's k largest (or smallest) values."""
        fill = jnp.asarray(-jnp.inf if largest else jnp.inf, xsel.dtype)
        arg_extreme = jnp.argmax if largest else jnp.argmin

        if k <= _UNROLL_K:
            # One XLU reduce per step; accumulate a removal mask and do a
            # single masked row-sum at the end (k+1 reductions instead of 2k).
            # The same `mask` drives both the accumulation and the +/-inf
            # knock-out, so tied values (e.g. ReLU zeros) are removed one at a
            # time -- matching torch.sort + narrow semantics.
            v = xsel
            removed = None
            for t in range(k):
                idx = arg_extreme(v, axis=-1, keepdims=True)
                mask = col == idx
                removed = mask if removed is None else jnp.logical_or(removed, mask)
                if t + 1 < k:                      # last knock-out is dead code
                    v = jnp.where(mask, fill, v)
            # (This reduce could also be routed to the idle MXU as a dot with a
            #  ones column; the XLU has ample slack at k+1 reduces per loop.)
            return jnp.sum(jnp.where(removed, xf32, 0.0), axis=-1, keepdims=True)

        # Large / fractional k: bounded-size loop, no O(k) code blow-up.
        def body(_, carry):
            v, acc = carry
            m = (jnp.max if largest else jnp.min)(v, axis=-1, keepdims=True)
            idx = arg_extreme(v, axis=-1, keepdims=True)
            v = jnp.where(col == idx, fill, v)
            return v, acc + m.astype(jnp.float32)

        zero = jnp.zeros((xsel.shape[0], 1), jnp.float32)
        _, acc = lax.fori_loop(0, k, body, (xsel, zero))
        return acc

    out = extreme_sum(kmax, True) * (1.0 / float(kmax))
    if kmin > 0 and alpha != 0.0:
        out = out + extreme_sum(kmin, False) * (float(alpha) / float(kmin))

    # (row_tile, 1) float32 column: 128x less HBM writeback than a 128-lane
    # broadcast and no bf16 rounding of the per-row result.
    o_ref[...] = out.astype(o_ref.dtype)


def wildcat_pool2d(x, kmax, kmin, alpha):
    """Forward of WildcatPool2d. x: (b, c, h, w) -> (b, c)."""
    b, c, h, w = x.shape
    n = h * w
    kmax_i = _get_positive_k(kmax, n)
    kmin_i = _get_positive_k(kmin if kmin is not None else kmax, n)
    if kmax_i < 1:
        raise ValueError(
            "WildcatPool2d: kmax must resolve to >= 1 region (got %r)" % (kmax,))

    rows = b * c
    xf = x.reshape(rows, n)
    itemsize = xf.dtype.itemsize

    target_bytes, vmem_limit, min_steps, bf16_ok = _device_profile()
    row_tile = _choose_row_tile(rows, n, itemsize, target_bytes, min_steps)
    grid = pl.cdiv(rows, row_tile)   # no host-side pad; last block may be partial

    select_f32 = (xf.dtype == jnp.bfloat16 and not bf16_ok)

    kernel = functools.partial(
        _wildcat_kernel, kmax=kmax_i, kmin=kmin_i, alpha=float(alpha),
        select_f32=select_f32)

    cost = pl.CostEstimate(
        flops=3 * (kmax_i + kmin_i + 2) * rows * n,
        transcendentals=0,
        bytes_accessed=rows * n * itemsize + rows * 4,
    )

    out = pl.pallas_call(
        kernel,
        out_shape=jax.ShapeDtypeStruct((rows, 1), jnp.float32),
        grid_spec=pltpu.PrefetchScalarGridSpec(
            num_scalar_prefetch=0,
            grid=(grid,),
            in_specs=[pl.BlockSpec((row_tile, n), lambda i: (i, 0))],
            out_specs=pl.BlockSpec((row_tile, 1), lambda i: (i, 0)),
        ),
        compiler_params=pltpu.CompilerParams(
            dimension_semantics=("parallel",),
            vmem_limit_bytes=vmem_limit,
        ),
        cost_estimate=cost,
    )(xf)

    # Column 0 holds the per-row result; garbage rows of the partial last
    # block were never written back.  Cast back to the module's output dtype.
    return out[:, 0].reshape(b, c).astype(x.dtype)


def _wildcat_ref(x, kmax, kmin, alpha):
    """Pure-JAX reference mirroring the PyTorch forward."""
    b, c, h, w = x.shape
    n = h * w
    kmax_i = _get_positive_k(kmax, n)
    kmin_i = _get_positive_k(kmin if kmin is not None else kmax, n)
    flat = x.reshape(b, c, n)
    srt = -jnp.sort(-flat, axis=2)  # descending
    out = srt[:, :, :kmax_i].sum(2) / kmax_i
    if kmin_i > 0 and alpha != 0.0:
        out = out + srt[:, :, n - kmin_i:].sum(2) * (alpha / kmin_i)
    return out


# TODO(synk): only the forward pass is implemented; the custom autograd
# backward (scatter of grad into top-k/bottom-k indices) is out of scope here.


if __name__ == "__main__":
    key = jax.random.PRNGKey(0)

    # Primary check: shapes from the module's typical use.
    b, c, h, w = 2, 4, 16, 16
    x = jax.random.normal(key, (b, c, h, w), dtype=jnp.float32)
    kmax, kmin, alpha = 3, 3, 0.7
    y = jax.block_until_ready(wildcat_pool2d(x, kmax, kmin, alpha))
    y_ref = _wildcat_ref(x, kmax, kmin, alpha)
    assert y.shape == (b, c), y.shape
    assert jnp.allclose(y, y_ref, atol=1e-5, rtol=1e-5), (y, y_ref)

    # Partial last block: rows=9 not divisible by the 8-row tile (no host pad).
    x2 = jax.random.normal(jax.random.PRNGKey(1), (3, 3, h, w), dtype=jnp.float32)
    y2 = jax.block_until_ready(wildcat_pool2d(x2, 2, 2, 0.5))
    y2_ref = _wildcat_ref(x2, 2, 2, 0.5)
    assert y2.shape == (3, 3), y2.shape
    assert jnp.allclose(y2, y2_ref, atol=1e-5, rtol=1e-5), (y2, y2_ref)

    # bf16 inputs: selection stays bf16 on v6e/v7x, promoted to f32 on v4/v5.
    xb = x.astype(jnp.bfloat16)
    yb = jax.block_until_ready(wildcat_pool2d(xb, kmax, kmin, alpha))
    yb_ref = _wildcat_ref(xb, kmax, kmin, alpha)
    assert jnp.allclose(yb.astype(jnp.float32), yb_ref.astype(jnp.float32),
                        atol=5e-2, rtol=5e-2), (yb, yb_ref)

    # Fractional k (0.05 of 256 -> k=13): exercises the bounded fori_loop path.
    y3 = jax.block_until_ready(wildcat_pool2d(x, 0.05, 0.05, 0.3))
    y3_ref = _wildcat_ref(x, 0.05, 0.05, 0.3)
    assert jnp.allclose(y3, y3_ref, atol=1e-4, rtol=1e-4), (y3, y3_ref)

    print("KERNEL_OK")
</pallas_src>

<mosaic_0001>
module attributes {stable_mosaic.version = 11 : i64} {
  func.func @_wildcat_kernel(%arg0: i32, %arg1: memref<8x256xf32, #tpu.memory_space<vmem>>, %arg2: memref<8x1xf32, #tpu.memory_space<vmem>>) attributes {dimension_semantics = [#tpu.dimension_semantics<parallel>], iteration_bounds = array<i64: 1>, scalar_prefetch = 0 : i64, scratch_operands = 0 : i64, tpu.core_type = #tpu.core_type<tc>, window_params = [{transform_indices = @transform_0, window_bounds = array<i64: 8, 256>}, {transform_indices = @transform_1, window_bounds = array<i64: 8, 1>}]} {
    %c0 = arith.constant 0 : index
    %c0_0 = arith.constant 0 : index
    %0 = vector.load %arg1[%c0, %c0_0] : memref<8x256xf32, #tpu.memory_space<vmem>>, vector<8x256xf32>
    %1 = tpu.iota {dimensions = array<i32: 1>} : vector<8x256xi32>
    %2 = tpu.reduce_index %0 {axis = 1 : i32, kind = #tpu.reduction_kind<arg_max>} : vector<8x256xf32> -> vector<8xi32>
    %3 = vector.shape_cast %2 : vector<8xi32> to vector<8x1xi32>
    %4 = vector.broadcast %3 : vector<8x1xi32> to vector<8x256xi32>
    %5 = arith.cmpi eq, %1, %4 : vector<8x256xi32>
    %cst = arith.constant 0xFF800000 : f32
    %6 = vector.broadcast %cst : f32 to vector<8x256xf32>
    %7 = arith.select %5, %6, %0 : vector<8x256xi1>, vector<8x256xf32>
    %8 = tpu.reduce_index %7 {axis = 1 : i32, kind = #tpu.reduction_kind<arg_max>} : vector<8x256xf32> -> vector<8xi32>
    %9 = vector.shape_cast %8 : vector<8xi32> to vector<8x1xi32>
    %10 = vector.broadcast %9 : vector<8x1xi32> to vector<8x256xi32>
    %11 = arith.cmpi eq, %1, %10 : vector<8x256xi32>
    %12 = arith.ori %5, %11 : vector<8x256xi1>
    %cst_1 = arith.constant 0xFF800000 : f32
    %13 = vector.broadcast %cst_1 : f32 to vector<8x256xf32>
    %14 = arith.select %11, %13, %7 : vector<8x256xi1>, vector<8x256xf32>
    %15 = tpu.reduce_index %14 {axis = 1 : i32, kind = #tpu.reduction_kind<arg_max>} : vector<8x256xf32> -> vector<8xi32>
    %16 = vector.shape_cast %15 : vector<8xi32> to vector<8x1xi32>
    %17 = vector.broadcast %16 : vector<8x1xi32> to vector<8x256xi32>
    %18 = arith.cmpi eq, %1, %17 : vector<8x256xi32>
    %19 = arith.ori %12, %18 : vector<8x256xi1>
    %cst_2 = arith.constant 0.000000e+00 : f32
    %20 = vector.broadcast %cst_2 : f32 to vector<8x256xf32>
    %21 = arith.select %19, %0, %20 : vector<8x256xi1>, vector<8x256xf32>
    %cst_3 = arith.constant dense<0.000000e+00> : vector<8xf32>
    %22 = vector.multi_reduction <add>, %21, %cst_3 [1] : vector<8x256xf32> to vector<8xf32>
    %23 = vector.shape_cast %22 : vector<8xf32> to vector<8x1xf32>
    %cst_4 = arith.constant 0.333333343 : f32
    %24 = vector.broadcast %cst_4 : f32 to vector<8x1xf32>
    %25 = arith.mulf %23, %24 : vector<8x1xf32>
    %26 = tpu.reduce_index %0 {axis = 1 : i32, kind = #tpu.reduction_kind<arg_min>} : vector<8x256xf32> -> vector<8xi32>
    %27 = vector.shape_cast %26 : vector<8xi32> to vector<8x1xi32>
    %28 = vector.broadcast %27 : vector<8x1xi32> to vector<8x256xi32>
    %29 = arith.cmpi eq, %1, %28 : vector<8x256xi32>
    %cst_5 = arith.constant 0x7F800000 : f32
    %30 = vector.broadcast %cst_5 : f32 to vector<8x256xf32>
    %31 = arith.select %29, %30, %0 : vector<8x256xi1>, vector<8x256xf32>
    %32 = tpu.reduce_index %31 {axis = 1 : i32, kind = #tpu.reduction_kind<arg_min>} : vector<8x256xf32> -> vector<8xi32>
    %33 = vector.shape_cast %32 : vector<8xi32> to vector<8x1xi32>
    %34 = vector.broadcast %33 : vector<8x1xi32> to vector<8x256xi32>
    %35 = arith.cmpi eq, %1, %34 : vector<8x256xi32>
    %36 = arith.ori %29, %35 : vector<8x256xi1>
    %cst_6 = arith.constant 0x7F800000 : f32
    %37 = vector.broadcast %cst_6 : f32 to vector<8x256xf32>
    %38 = arith.select %35, %37, %31 : vector<8x256xi1>, vector<8x256xf32>
    %39 = tpu.reduce_index %38 {axis = 1 : i32, kind = #tpu.reduction_kind<arg_min>} : vector<8x256xf32> -> vector<8xi32>
    %40 = vector.shape_cast %39 : vector<8xi32> to vector<8x1xi32>
    %41 = vector.broadcast %40 : vector<8x1xi32> to vector<8x256xi32>
    %42 = arith.cmpi eq, %1, %41 : vector<8x256xi32>
    %43 = arith.ori %36, %42 : vector<8x256xi1>
    %cst_7 = arith.constant 0.000000e+00 : f32
    %44 = vector.broadcast %cst_7 : f32 to vector<8x256xf32>
    %45 = arith.select %43, %0, %44 : vector<8x256xi1>, vector<8x256xf32>
    %cst_8 = arith.constant dense<0.000000e+00> : vector<8xf32>
    %46 = vector.multi_reduction <add>, %45, %cst_8 [1] : vector<8x256xf32> to vector<8xf32>
    %47 = vector.shape_cast %46 : vector<8xf32> to vector<8x1xf32>
    %cst_9 = arith.constant 0.233333334 : f32
    %48 = vector.broadcast %cst_9 : f32 to vector<8x1xf32>
    %49 = arith.mulf %47, %48 : vector<8x1xf32>
    %50 = arith.addf %25, %49 : vector<8x1xf32>
    %c0_10 = arith.constant 0 : index
    %c0_11 = arith.constant 0 : index
    %51 = vector.load %arg2[%c0_10, %c0_11] : memref<8x1xf32, #tpu.memory_space<vmem>>, vector<8x1xf32>
    tpu.vector_store %arg2[%c0_10, %c0_11], %50 {strides = array<i32>} : memref<8x1xf32, #tpu.memory_space<vmem>>, vector<8x1xf32>,
    return
  }
  func.func @transform_0(%arg0: i32) -> (i32, i32) {
    %c0_i32 = arith.constant 0 : i32
    %c0_i32_0 = arith.constant 0 : i32
    return %arg0, %c0_i32 : i32, i32
  }
  func.func @transform_1(%arg0: i32) -> (i32, i32) {
    %c0_i32 = arith.constant 0 : i32
    %c0_i32_0 = arith.constant 0 : i32
    return %arg0, %c0_i32 : i32, i32
  }
}

</mosaic_0001>

<bundles_post_ra>
// kernel: tpu_custom_call.1
= control target key start
LH: loop header
LB: loop body
LE: loop exit
PB: predicated region body
PF: predicated region fallthrough
CT: control target
= control target key end

     0   :  { %6 = vsyncpa [#allocation3], 0  ;;  %s153_s6 = smov [#allocation2]   ;;  %s260_s0 = inlined_call_operand.hbm [shape: f32[8,256], index: 0, kind: input, shape index: {}]   ;;  %s261_s1 = inlined_call_operand.vmem [shape: f32[8,1], index: 1, kind: output, shape index: {}]  }
   0x1   :  { %s13_s7 = sshll.u32 %s153_s6, 4  ;;  %s129_s10 = scalar_lea.hbm %s260_s0, 256  ;;  %s14_s7 = int_to_ptr.vmem [resolvable:$true] %s13_s7 }
   0x2   :  { %p130_p0 = scmp.ne.s32.totalorder %s260_s0, %s129_s10  ;;  %p133_p1 = scmp.lt.u32.totalorder %s129_s10, %s260_s0 }
   0x4   :  { %p135_p2 = pnand %p133_p1, %p130_p0 }
   0x6   :  { %138 = shalt.err (!%p135_p2)
}
   0x7   :  { %s139_s15 = scalar_lea.vmem %s14_s7, 256  ;;  %p144_p4 = scmp.lt.s32.totalorder %s14_s7, %s14_s7 }
   0x8   :  { %p140_p3 = scmp.ne.s32.totalorder %s14_s7, %s139_s15  ;;  %p145_p5 = scmp.lt.s32.totalorder %s139_s15, %s139_s15 }
   0xa   :  { %p146_p6 = por %p145_p5, %p144_p4 }
   0xc   :  { %p147_p7 = pnand %p146_p6, %p140_p3 }
   0xe   :  { %150 = shalt.err (!%p147_p7)
}
   0xf   :  { %16 = dma.hbm_to_vmem [thread:$0]  %s260_s0, 256, %s14_s7, [#allocation3]  }
  0x10   :  { %151 = dma.done.wait [#allocation3], 256  }
  0x11   :  { %152 = vsyncadd [#allocation3], 4294967040  ;;  %v176_v0 = vld [vmem:[#allocation2] sm:$0xff]  ;;  %v178_v1 = vld [vmem:[#allocation2 + $0x8] sm:$0xff]  ;;  %v22_v4 = vlaneseq }
  0x12   :  { %vm25_vm0 = vcmp.ge.f32.partialorder %v176_v0, %v178_v1  ;;  %vm69_vm1 = vcmp.le.f32.partialorder %v176_v0, %v178_v1 }
  0x13   :  { %v26_v2 = vsel %vm25_vm0, %v176_v0, %v178_v1  ;;  %v70_v3 = vsel %vm69_vm1, %v176_v0, %v178_v1  ;;  %v188_v5 = vand.u32 127, %v22_v4 }
  0x14   :  { %28 = vmax.index.xlane.f32.xlu0 %v26_v2 }
  0x15   :  { %v191_v6 = vadd.s32 128, %v188_v5 }
  0x17   :  { %v27_v8 = vsel %vm25_vm0, %v188_v5, %v191_v6  ;;  %v71_v10 = vsel %vm69_vm1, %v188_v5, %v191_v6 }
  0x18   :  { %72 = vmin.index.xlane.f32.xlu0 %v70_v3 }
  0xa1   :  { %v29_v7 = vpop.xlane.xlu0 %28 }
  0xa2   :  { %122 = vset.pattern.permute.xlu1 %v29_v7 }
  0xa5   :  { %v73_v9 = vpop.xlane.xlu0 %72 }
  0xa6   :  { %31 = vperm.xlu1 %122, %v27_v8  }
  0xaa   :  { %123 = vset.pattern.permute.xlu1 %v73_v9 }
  0xae   :  { %75 = vperm.xlu1 %123, %v71_v10  }
 0x125   :  { %v32_v11 = vpop.permute.xlu1 %31 }
 0x126   :  { %vm33_vm2 = vcmp.eq.s32.totalorder %v188_v5, %v32_v11  ;;  %vm34_vm3 = vcmp.eq.s32.totalorder %v191_v6, %v32_v11 }
 0x127   :  { %v35_v12 = vsel %vm33_vm2, -inf, %v176_v0  ;;  %v36_v13 = vsel %vm34_vm3, -inf, %v178_v1 }
 0x128   :  { %vm37_vm4 = vcmp.ge.f32.partialorder %v35_v12, %v36_v13 }
 0x129   :  { %v38_v14 = vsel %vm37_vm4, %v35_v12, %v36_v13  ;;  %v39_v20 = vsel %vm37_vm4, %v188_v5, %v191_v6 }
 0x12a   :  { %40 = vmax.index.xlane.f32.xlu0 %v38_v14 }
 0x12d   :  { %v76_v15 = vpop.permute.xlu1 %75 }
 0x12e   :  { %vm77_vm5 = vcmp.eq.s32.totalorder %v188_v5, %v76_v15  ;;  %vm78_vm6 = vcmp.eq.s32.totalorder %v191_v6, %v76_v15 }
 0x12f   :  { %v79_v16 = vsel %vm77_vm5, inf, %v176_v0  ;;  %v80_v17 = vsel %vm78_vm6, inf, %v178_v1 }
 0x130   :  { %vm81_vm7 = vcmp.le.f32.partialorder %v79_v16, %v80_v17 }
 0x131   :  { %v82_v18 = vsel %vm81_vm7, %v79_v16, %v80_v17  ;;  %v83_v22 = vsel %vm81_vm7, %v188_v5, %v191_v6 }
 0x132   :  { %84 = vmin.index.xlane.f32.xlu1 %v82_v18 }
 0x1b7   :  { %v41_v19 = vpop.xlane.xlu0 %40 }
 0x1b8   :  { %124 = vset.pattern.permute.xlu0 %v41_v19 }
 0x1bc   :  { %43 = vperm.xlu0 %124, %v39_v20  }
 0x1bf   :  { %v85_v21 = vpop.xlane.xlu1 %84 }
 0x1c0   :  { %125 = vset.pattern.permute.xlu1 %v85_v21 }
 0x1c4   :  { %87 = vperm.xlu1 %125, %v83_v22  }
 0x23b   :  { %v44_v23 = vpop.permute.xlu0 %43 }
 0x23c   :  { %vm45_vm8 = vcmp.eq.s32.totalorder %v188_v5, %v44_v23  ;;  %vm46_vm9 = vcmp.eq.s32.totalorder %v191_v6, %v44_v23 }
 0x23d   :  { %v49_v24 = vsel %vm45_vm8, -inf, %v35_v12  ;;  %v50_v25 = vsel %vm46_vm9, -inf, %v36_v13  ;;  %vm47_vm14 = vmor %vm33_vm2, %vm45_vm8 }
 0x23e   :  { %vm51_vm10 = vcmp.ge.f32.partialorder %v49_v24, %v50_v25  ;;  %vm48_vm15 = vmor %vm34_vm3, %vm46_vm9 }
 0x23f   :  { %v52_v26 = vsel %vm51_vm10, %v49_v24, %v50_v25  ;;  %v53_v32 = vsel %vm51_vm10, %v188_v5, %v191_v6 }
 0x240   :  { %54 = vmax.index.xlane.f32.xlu0 %v52_v26 }
 0x243   :  { %v88_v27 = vpop.permute.xlu1 %87 }
 0x244   :  { %vm89_vm11 = vcmp.eq.s32.totalorder %v188_v5, %v88_v27  ;;  %vm90_vm12 = vcmp.eq.s32.totalorder %v191_v6, %v88_v27 }
 0x245   :  { %v93_v28 = vsel %vm89_vm11, inf, %v79_v16  ;;  %v94_v29 = vsel %vm90_vm12, inf, %v80_v17  ;;  %vm91_vm2 = vmor %vm77_vm5, %vm89_vm11  ;;  %vm114_vm5 = vcmask 7168  }
 0x246   :  { %vm95_vm13 = vcmp.le.f32.partialorder %v93_v28, %v94_v29  ;;  %vm92_vm3 = vmor %vm78_vm6, %vm90_vm12 }
 0x247   :  { %v96_v30 = vsel %vm95_vm13, %v93_v28, %v94_v29  ;;  %v97_v34 = vsel %vm95_vm13, %v188_v5, %v191_v6 }
 0x248   :  { %98 = vmin.index.xlane.f32.xlu1 %v96_v30 }
 0x2cd   :  { %v55_v31 = vpop.xlane.xlu0 %54 }
 0x2ce   :  { %126 = vset.pattern.permute.xlu0 %v55_v31 }
 0x2d2   :  { %57 = vperm.xlu0 %126, %v53_v32  }
 0x2d5   :  { %v99_v33 = vpop.xlane.xlu1 %98 }
 0x2d6   :  { %128 = vset.pattern.permute.xlu0 %v99_v33  ;;  %127 = vset.pattern.permute.xlu1 %v99_v33 }
 0x2da   :  { %101 = vperm.xlu1 %127, %v97_v34  }
 0x351   :  { %v58_v35 = vpop.permute.xlu0 %57 }
 0x352   :  { %vm59_vm0 = vcmp.eq.s32.totalorder %v188_v5, %v58_v35  ;;  %vm60_vm1 = vcmp.eq.s32.totalorder %v191_v6, %v58_v35 }
 0x353   :  { %vm61_vm4 = vmor %vm47_vm14, %vm59_vm0 }
 0x354   :  { %vm62_vm7 = vmor %vm48_vm15, %vm60_vm1  ;;  %v63_v36 = vsel %vm61_vm4, %v176_v0, 0.0 }
 0x355   :  { %v64_v37 = vsel %vm62_vm7, %v178_v1, 0.0 }
 0x356   :  { %v65_v38 = vadd.f32 %v64_v37, %v63_v36 }
 0x358   :  { %66 = vadd.xlane.f32.xlu1 %v65_v38 }
 0x359   :  { %v102_v39 = vpop.permute.xlu1 %101 }
 0x35a   :  { %vm103_vm8 = vcmp.eq.s32.totalorder %v188_v5, %v102_v39  ;;  %vm104_vm9 = vcmp.eq.s32.totalorder %v191_v6, %v102_v39 }
 0x35b   :  { %vm105_vm10 = vmor %vm91_vm2, %vm103_vm8 }
 0x35c   :  { %vm106_vm13 = vmor %vm92_vm3, %vm104_vm9  ;;  %v107_v40 = vsel %vm105_vm10, %v176_v0, 0.0 }
 0x35d   :  { %v108_v41 = vsel %vm106_vm13, %v178_v1, 0.0 }
 0x35e   :  { %v109_v42 = vadd.f32 %v108_v41, %v107_v40 }
 0x360   :  { %110 = vadd.xlane.f32.xlu0 %v109_v42 }
 0x3e5   :  { %v67_v43 = vpop.xlane.xlu1 %66 }
 0x3e6   :  { %v68_v45 = vmul.f32 0.33333334, %v67_v43 }
 0x3ed   :  { %v111_v44 = vpop.xlane.xlu0 %110 }
 0x3ee   :  { %v112_v46 = vmul.f32 0.23333333, %v111_v44 }
 0x3f0   :  { %v113_v47 = vadd.f32 %v112_v46, %v68_v45 }
 0x3f2   :  { %115 = vst.msk [vmem:[%s261_s1] sm:$0xff] %vm114_vm5, %v113_v47 }
 0x3f3   :  { %120 = vsyncpa [#allocation3], 1 }

</bundles_post_ra>
